<compile_context>
chip_gen: v7x
topology: tpu7x:2x2x1
jax: 0.10.0
libtpu: 0.0.40
codegen_flags: <defaults>
</compile_context>

<pallas_src>
import functools

import jax
import jax.numpy as jnp
from jax.experimental import pallas as pl
from jax.experimental.pallas import tpu as pltpu


def _leaky_relu(x, negative_slope=0.0001):
    return jnp.where(x > 0, x, negative_slope * x)


def _round_up(n, m):
    return ((n + m - 1) // m) * m


def _pad2(a, rows, cols):
    return jnp.pad(a, ((0, rows - a.shape[0]), (0, cols - a.shape[1])))


def actor_kernel(x_ref,
                 w1_ref, b1_ref,
                 w2_ref, b2_ref,
                 w3_ref, b3_ref,
                 wmu_ref, bmu_ref,
                 mu_ref):
    # MXU operand dtype (f32 or bf16); accumulation + elementwise stay f32.
    cdt = w1_ref.dtype

    x = x_ref[...]

    h = jnp.dot(x, w1_ref[...], preferred_element_type=jnp.float32) + b1_ref[...]
    h = _leaky_relu(h)

    h = jnp.dot(h.astype(cdt), w2_ref[...],
                preferred_element_type=jnp.float32) + b2_ref[...]
    h = _leaky_relu(h)

    h = jnp.dot(h.astype(cdt), w3_ref[...],
                preferred_element_type=jnp.float32) + b3_ref[...]
    h = _leaky_relu(h)

    mu = jnp.dot(h.astype(cdt), wmu_ref[...],
                 preferred_element_type=jnp.float32) + bmu_ref[...]
    # Lane-dense store: mu_ref is a full (TB, OUT_pad>=128) slab.
    mu_ref[...] = jnp.tanh(mu).astype(mu_ref.dtype)


@functools.partial(jax.jit, static_argnames=("block_b", "compute_dtype"))
def actor_network_user_forward(x, params, *, block_b=512,
                               compute_dtype=jnp.float32):
    """x: (B, input_size); params: dict of (in, out) weights and (1, out) biases."""
    B, input_size = x.shape
    hidden_size = params["w1"].shape[1]
    action_size = params["wmu"].shape[1]

    # Lane-align every feature dim (K and N multiples of 128).
    IN = _round_up(input_size, 128)
    H = _round_up(hidden_size, 128)
    OUT = _round_up(action_size, 128)

    # Batch tile: 512 rows for big batches, otherwise a single (8|16)-aligned tile.
    sub = 16 if compute_dtype == jnp.bfloat16 else 8
    TB = block_b if B >= block_b else _round_up(B, sub)
    Bp = _round_up(B, TB)

    # Zero-pad operands. Padded weight rows/cols and bias entries are zero, so
    # padded activations stay exactly zero through every layer -> slicing the
    # output back is exact.
    xp = _pad2(x.astype(compute_dtype), Bp, IN)
    w1 = _pad2(params["w1"], IN, H).astype(compute_dtype)
    w2 = _pad2(params["w2"], H, H).astype(compute_dtype)
    w3 = _pad2(params["w3"], H, H).astype(compute_dtype)
    wmu = _pad2(params["wmu"], H, OUT).astype(compute_dtype)
    b1 = _pad2(params["b1"].astype(jnp.float32), 1, H)
    b2 = _pad2(params["b2"].astype(jnp.float32), 1, H)
    b3 = _pad2(params["b3"].astype(jnp.float32), 1, H)
    bmu = _pad2(params["bmu"].astype(jnp.float32), 1, OUT)

    grid = (Bp // TB,)

    # Weights/biases: full-shape blocks, constant index_map -> stay resident
    # in VMEM across grid steps (no re-DMA). x / mu tiles are double-buffered.
    resident = lambda shape: pl.BlockSpec(shape, lambda i: (0, 0))

    itemsize = jnp.dtype(compute_dtype).itemsize
    flops = 2 * Bp * (IN * H + 2 * H * H + H * OUT)
    bytes_accessed = (
        itemsize * (xp.size + w1.size + w2.size + w3.size + wmu.size)
        + 4 * (b1.size + b2.size + b3.size + bmu.size + Bp * OUT))

    mu_pad = pl.pallas_call(
        actor_kernel,
        out_shape=jax.ShapeDtypeStruct((Bp, OUT), jnp.float32),
        grid=grid,
        in_specs=[
            pl.BlockSpec((TB, IN), lambda i: (i, 0)),
            resident((IN, H)), resident((1, H)),
            resident((H, H)), resident((1, H)),
            resident((H, H)), resident((1, H)),
            resident((H, OUT)), resident((1, OUT)),
        ],
        out_specs=pl.BlockSpec((TB, OUT), lambda i: (i, 0)),
        compiler_params=pltpu.CompilerParams(
            dimension_semantics=("parallel",)),
        cost_estimate=pl.CostEstimate(
            flops=flops,
            transcendentals=Bp * OUT,
            bytes_accessed=bytes_accessed),
    )(xp, w1, b1, w2, b2, w3, b3, wmu, bmu)

    return mu_pad[:B, :action_size]


def init_params(key, input_size, hidden_size=100, action_size=1):
    """PyTorch nn.Linear-style init (U[-1/sqrt(fan_in), +1/sqrt(fan_in)])."""
    def linear(key, fan_in, fan_out):
        kw, kb = jax.random.split(key)
        bound = 1.0 / jnp.sqrt(fan_in)
        # weight stored transposed relative to PyTorch: (in, out)
        w = jax.random.uniform(kw, (fan_in, fan_out), jnp.float32, -bound, bound)
        b = jax.random.uniform(kb, (1, fan_out), jnp.float32, -bound, bound)
        return w, b

    k1, k2, k3, k4, _k5 = jax.random.split(key, 5)
    w1, b1 = linear(k1, input_size, hidden_size)
    w2, b2 = linear(k2, hidden_size, hidden_size)
    w3, b3 = linear(k3, hidden_size, hidden_size)
    wmu, bmu = linear(k4, hidden_size, action_size)
    # NOTE: the PyTorch module also defines self.sigma, but forward() never
    # uses it, so it is intentionally omitted.
    return {"w1": w1, "b1": b1, "w2": w2, "b2": b2,
            "w3": w3, "b3": b3, "wmu": wmu, "bmu": bmu}


def reference_forward(x, params):
    h = x @ params["w1"] + params["b1"]
    h = jnp.where(h > 0, h, 0.0001 * h)
    h = h @ params["w2"] + params["b2"]
    h = jnp.where(h > 0, h, 0.0001 * h)
    h = h @ params["w3"] + params["b3"]
    h = jnp.where(h > 0, h, 0.0001 * h)
    return jnp.tanh(h @ params["wmu"] + params["bmu"])


if __name__ == "__main__":
    key = jax.random.PRNGKey(0)
    kx, kp = jax.random.split(key)

    batch = 2
    input_size = 16
    hidden_size = 32
    action_size = 1

    x = jax.random.normal(kx, (batch, input_size), jnp.float32)
    params = init_params(kp, input_size, hidden_size, action_size)

    ref = reference_forward(x, params)

    # f32 path (exact vs reference).
    mu = actor_network_user_forward(x, params)
    mu = jax.block_until_ready(mu)
    assert mu.shape == (batch, action_size)
    assert jnp.allclose(mu, ref, atol=1e-5, rtol=1e-5), (mu, ref)

    # bf16-MXU path (for v6e/v7x); f32 elementwise + accumulation, loose tol.
    mu_bf16 = actor_network_user_forward(x, params, compute_dtype=jnp.bfloat16)
    mu_bf16 = jax.block_until_ready(mu_bf16)
    assert mu_bf16.shape == (batch, action_size)
    assert jnp.allclose(mu_bf16, ref, atol=1e-1), (mu_bf16, ref)

    print("KERNEL_OK")
</pallas_src>

<mosaic_0001>
module attributes {stable_mosaic.version = 11 : i64} {
  func.func @actor_kernel(%arg0: i32, %arg1: memref<8x128xf32, #tpu.memory_space<vmem>>, %arg2: memref<128x128xf32, #tpu.memory_space<vmem>>, %arg3: memref<1x128xf32, #tpu.memory_space<vmem>>, %arg4: memref<128x128xf32, #tpu.memory_space<vmem>>, %arg5: memref<1x128xf32, #tpu.memory_space<vmem>>, %arg6: memref<128x128xf32, #tpu.memory_space<vmem>>, %arg7: memref<1x128xf32, #tpu.memory_space<vmem>>, %arg8: memref<128x128xf32, #tpu.memory_space<vmem>>, %arg9: memref<1x128xf32, #tpu.memory_space<vmem>>, %arg10: memref<8x128xf32, #tpu.memory_space<vmem>>) attributes {dimension_semantics = [#tpu.dimension_semantics<parallel>], iteration_bounds = array<i64: 1>, scalar_prefetch = 0 : i64, scratch_operands = 0 : i64, tpu.core_type = #tpu.core_type<tc>, window_params = [{transform_indices = @transform_0, window_bounds = array<i64: 8, 128>}, {pipeline_mode = #tpu.pipeline_mode<synchronous>, transform_indices = @transform_1, window_bounds = array<i64: 128, 128>}, {pipeline_mode = #tpu.pipeline_mode<synchronous>, transform_indices = @transform_2, window_bounds = array<i64: 1, 128>}, {pipeline_mode = #tpu.pipeline_mode<synchronous>, transform_indices = @transform_3, window_bounds = array<i64: 128, 128>}, {pipeline_mode = #tpu.pipeline_mode<synchronous>, transform_indices = @transform_4, window_bounds = array<i64: 1, 128>}, {pipeline_mode = #tpu.pipeline_mode<synchronous>, transform_indices = @transform_5, window_bounds = array<i64: 128, 128>}, {pipeline_mode = #tpu.pipeline_mode<synchronous>, transform_indices = @transform_6, window_bounds = array<i64: 1, 128>}, {pipeline_mode = #tpu.pipeline_mode<synchronous>, transform_indices = @transform_7, window_bounds = array<i64: 128, 128>}, {pipeline_mode = #tpu.pipeline_mode<synchronous>, transform_indices = @transform_8, window_bounds = array<i64: 1, 128>}, {transform_indices = @transform_9, window_bounds = array<i64: 8, 128>}]} {
    %c0 = arith.constant 0 : index
    %c0_0 = arith.constant 0 : index
    %0 = vector.load %arg1[%c0, %c0_0] : memref<8x128xf32, #tpu.memory_space<vmem>>, vector<8x128xf32>
    %c0_1 = arith.constant 0 : index
    %c0_2 = arith.constant 0 : index
    %1 = vector.load %arg2[%c0_1, %c0_2] : memref<128x128xf32, #tpu.memory_space<vmem>>, vector<128x128xf32>
    %cst = arith.constant dense<0.000000e+00> : vector<8x128xf32>
    %2 = tpu.matmul %0, %1, %cst {dimension_numbers = #tpu.dot_dimension_numbers<[1], [0], [0], [1], [0, 0, 1, 1], [], []>} : vector<8x128xf32>, vector<128x128xf32>, vector<8x128xf32> -> vector<8x128xf32>
    %c0_3 = arith.constant 0 : index
    %c0_4 = arith.constant 0 : index
    %3 = vector.load %arg3[%c0_3, %c0_4] : memref<1x128xf32, #tpu.memory_space<vmem>>, vector<1x128xf32>
    %4 = vector.broadcast %3 : vector<1x128xf32> to vector<8x128xf32>
    %5 = arith.addf %2, %4 : vector<8x128xf32>
    %cst_5 = arith.constant 0.000000e+00 : f32
    %6 = vector.broadcast %cst_5 : f32 to vector<8x128xf32>
    %7 = arith.cmpf ogt, %5, %6 : vector<8x128xf32>
    %cst_6 = arith.constant 9.99999974E-5 : f32
    %8 = vector.broadcast %cst_6 : f32 to vector<8x128xf32>
    %9 = arith.mulf %8, %5 : vector<8x128xf32>
    %10 = arith.select %7, %5, %9 : vector<8x128xi1>, vector<8x128xf32>
    %c0_7 = arith.constant 0 : index
    %c0_8 = arith.constant 0 : index
    %11 = vector.load %arg4[%c0_7, %c0_8] : memref<128x128xf32, #tpu.memory_space<vmem>>, vector<128x128xf32>
    %cst_9 = arith.constant dense<0.000000e+00> : vector<8x128xf32>
    %12 = tpu.matmul %10, %11, %cst_9 {dimension_numbers = #tpu.dot_dimension_numbers<[1], [0], [0], [1], [0, 0, 1, 1], [], []>} : vector<8x128xf32>, vector<128x128xf32>, vector<8x128xf32> -> vector<8x128xf32>
    %c0_10 = arith.constant 0 : index
    %c0_11 = arith.constant 0 : index
    %13 = vector.load %arg5[%c0_10, %c0_11] : memref<1x128xf32, #tpu.memory_space<vmem>>, vector<1x128xf32>
    %14 = vector.broadcast %13 : vector<1x128xf32> to vector<8x128xf32>
    %15 = arith.addf %12, %14 : vector<8x128xf32>
    %cst_12 = arith.constant 0.000000e+00 : f32
    %16 = vector.broadcast %cst_12 : f32 to vector<8x128xf32>
    %17 = arith.cmpf ogt, %15, %16 : vector<8x128xf32>
    %cst_13 = arith.constant 9.99999974E-5 : f32
    %18 = vector.broadcast %cst_13 : f32 to vector<8x128xf32>
    %19 = arith.mulf %18, %15 : vector<8x128xf32>
    %20 = arith.select %17, %15, %19 : vector<8x128xi1>, vector<8x128xf32>
    %c0_14 = arith.constant 0 : index
    %c0_15 = arith.constant 0 : index
    %21 = vector.load %arg6[%c0_14, %c0_15] : memref<128x128xf32, #tpu.memory_space<vmem>>, vector<128x128xf32>
    %cst_16 = arith.constant dense<0.000000e+00> : vector<8x128xf32>
    %22 = tpu.matmul %20, %21, %cst_16 {dimension_numbers = #tpu.dot_dimension_numbers<[1], [0], [0], [1], [0, 0, 1, 1], [], []>} : vector<8x128xf32>, vector<128x128xf32>, vector<8x128xf32> -> vector<8x128xf32>
    %c0_17 = arith.constant 0 : index
    %c0_18 = arith.constant 0 : index
    %23 = vector.load %arg7[%c0_17, %c0_18] : memref<1x128xf32, #tpu.memory_space<vmem>>, vector<1x128xf32>
    %24 = vector.broadcast %23 : vector<1x128xf32> to vector<8x128xf32>
    %25 = arith.addf %22, %24 : vector<8x128xf32>
    %cst_19 = arith.constant 0.000000e+00 : f32
    %26 = vector.broadcast %cst_19 : f32 to vector<8x128xf32>
    %27 = arith.cmpf ogt, %25, %26 : vector<8x128xf32>
    %cst_20 = arith.constant 9.99999974E-5 : f32
    %28 = vector.broadcast %cst_20 : f32 to vector<8x128xf32>
    %29 = arith.mulf %28, %25 : vector<8x128xf32>
    %30 = arith.select %27, %25, %29 : vector<8x128xi1>, vector<8x128xf32>
    %c0_21 = arith.constant 0 : index
    %c0_22 = arith.constant 0 : index
    %31 = vector.load %arg8[%c0_21, %c0_22] : memref<128x128xf32, #tpu.memory_space<vmem>>, vector<128x128xf32>
    %cst_23 = arith.constant dense<0.000000e+00> : vector<8x128xf32>
    %32 = tpu.matmul %30, %31, %cst_23 {dimension_numbers = #tpu.dot_dimension_numbers<[1], [0], [0], [1], [0, 0, 1, 1], [], []>} : vector<8x128xf32>, vector<128x128xf32>, vector<8x128xf32> -> vector<8x128xf32>
    %c0_24 = arith.constant 0 : index
    %c0_25 = arith.constant 0 : index
    %33 = vector.load %arg9[%c0_24, %c0_25] : memref<1x128xf32, #tpu.memory_space<vmem>>, vector<1x128xf32>
    %34 = vector.broadcast %33 : vector<1x128xf32> to vector<8x128xf32>
    %35 = arith.addf %32, %34 : vector<8x128xf32>
    %36 = math.tanh %35 : vector<8x128xf32>
    %c0_26 = arith.constant 0 : index
    %c0_27 = arith.constant 0 : index
    %37 = vector.load %arg10[%c0_26, %c0_27] : memref<8x128xf32, #tpu.memory_space<vmem>>, vector<8x128xf32>
    tpu.vector_store %arg10[%c0_26, %c0_27], %36 {strides = array<i32>} : memref<8x128xf32, #tpu.memory_space<vmem>>, vector<8x128xf32>,
    return
  }
  func.func @transform_0(%arg0: i32) -> (i32, i32) {
    %c0_i32 = arith.constant 0 : i32
    %c0_i32_0 = arith.constant 0 : i32
    return %arg0, %c0_i32 : i32, i32
  }
  func.func @transform_1(%arg0: i32) -> (i32, i32) {
    %c0_i32 = arith.constant 0 : i32
    %c0_i32_0 = arith.constant 0 : i32
    %c0_i32_1 = arith.constant 0 : i32
    return %c0_i32, %c0_i32_0 : i32, i32
  }
  func.func @transform_2(%arg0: i32) -> (i32, i32) {
    %c0_i32 = arith.constant 0 : i32
    %c0_i32_0 = arith.constant 0 : i32
    %c0_i32_1 = arith.constant 0 : i32
    return %c0_i32, %c0_i32_0 : i32, i32
  }
  func.func @transform_3(%arg0: i32) -> (i32, i32) {
    %c0_i32 = arith.constant 0 : i32
    %c0_i32_0 = arith.constant 0 : i32
    %c0_i32_1 = arith.constant 0 : i32
    return %c0_i32, %c0_i32_0 : i32, i32
  }
  func.func @transform_4(%arg0: i32) -> (i32, i32) {
    %c0_i32 = arith.constant 0 : i32
    %c0_i32_0 = arith.constant 0 : i32
    %c0_i32_1 = arith.constant 0 : i32
    return %c0_i32, %c0_i32_0 : i32, i32
  }
  func.func @transform_5(%arg0: i32) -> (i32, i32) {
    %c0_i32 = arith.constant 0 : i32
    %c0_i32_0 = arith.constant 0 : i32
    %c0_i32_1 = arith.constant 0 : i32
    return %c0_i32, %c0_i32_0 : i32, i32
  }
  func.func @transform_6(%arg0: i32) -> (i32, i32) {
    %c0_i32 = arith.constant 0 : i32
    %c0_i32_0 = arith.constant 0 : i32
    %c0_i32_1 = arith.constant 0 : i32
    return %c0_i32, %c0_i32_0 : i32, i32
  }
  func.func @transform_7(%arg0: i32) -> (i32, i32) {
    %c0_i32 = arith.constant 0 : i32
    %c0_i32_0 = arith.constant 0 : i32
    %c0_i32_1 = arith.constant 0 : i32
    return %c0_i32, %c0_i32_0 : i32, i32
  }
  func.func @transform_8(%arg0: i32) -> (i32, i32) {
    %c0_i32 = arith.constant 0 : i32
    %c0_i32_0 = arith.constant 0 : i32
    %c0_i32_1 = arith.constant 0 : i32
    return %c0_i32, %c0_i32_0 : i32, i32
  }
  func.func @transform_9(%arg0: i32) -> (i32, i32) {
    %c0_i32 = arith.constant 0 : i32
    %c0_i32_0 = arith.constant 0 : i32
    return %arg0, %c0_i32 : i32, i32
  }
}

</mosaic_0001>

<bundles_post_ra>
// kernel: actor_network_user_forward.1
= control target key start
LH: loop header
LB: loop body
LE: loop exit
PB: predicated region body
PF: predicated region fallthrough
CT: control target
= control target key end

     0   :  { %v733_v0 = vmov 0.0|0.0   ;;  %vm734_vm0 = vmmov 0   ;;  %v735_v4 = vmov 0.0   ;;  %s1036_s1 = inlined_call_operand.vmem [shape: f32[128,128], index: 1, kind: input, shape index: {}]   ;;  %s1037_s3 = inlined_call_operand.vmem [shape: f32[128,128], index: 3, kind: input, shape index: {}]   ;;  %s1038_s0 = inlined_call_operand.vmem [shape: f32[8,128], index: 0, kind: input, shape index: {}]   ;;  %s1039_s5 = inlined_call_operand.vmem [shape: f32[128,128], index: 5, kind: input, shape index: {}]   ;;  %s1040_s2 = inlined_call_operand.vmem [shape: f32[1,128], index: 2, kind: input, shape index: {}]   ;;  %s1041_s7 = inlined_call_operand.vmem [shape: f32[128,128], index: 7, kind: input, shape index: {}]   ;;  %s1042_s4 = inlined_call_operand.vmem [shape: f32[1,128], index: 4, kind: input, shape index: {}]   ;;  %s1043_s6 = inlined_call_operand.vmem [shape: f32[1,128], index: 6, kind: input, shape index: {}]   ;;  %s1044_s8 = inlined_call_operand.vmem [shape: f32[1,128], index: 8, kind: input, shape index: {}]   ;;  %s1045_s9 = inlined_call_operand.vmem [shape: f32[8,128], index: 9, kind: output, shape index: {}]  }
   0x1   :  { %632 = vmatprep.subr.bf16.mxu0 %v733_v0  ;;  %v33_v1 = vld [vmem:[%s1036_s1] sm:$0xff]  ;;  %v34_v2 = vld [vmem:[%s1036_s1 + $0x8] sm:$0xff]  ;;  %v35_v3 = vld [vmem:[%s1036_s1 + $0x10] sm:$0xff]  ;;  %524 = vmatprep.mubr.msk.f32.mxu0 %vm734_vm0, %v735_v4 }
   0x2   :  { %v633_v5 = vpack.c.bf16 %v34_v2, %v33_v1  ;;  %v36_v6 = vld [vmem:[%s1036_s1 + $0x18] sm:$0xff]  ;;  %656 = vmatprep.subr.bf16.mxu1 %v733_v0  ;;  %559 = vmatprep.mubr.msk.f32.mxu1 %vm734_vm0, %v735_v4  ;;  %v37_v8 = vld [vmem:[%s1036_s1 + $0x20] sm:$0xff]  ;;  %v38_v9 = vld [vmem:[%s1036_s1 + $0x28] sm:$0xff] }
   0x3   :  { %v636_v7 = vpack.c.bf16 %v36_v6, %v35_v3  ;;  %v129_v10 = vld [vmem:[%s1037_s3] sm:$0xff]  ;;  %v130_v11 = vld [vmem:[%s1037_s3 + $0x8] sm:$0xff]  ;;  %v131_v12 = vld [vmem:[%s1037_s3 + $0x10] sm:$0xff]  ;;  %v639_v14 = vpack.c.bf16 %v38_v9, %v37_v8 }
   0x4   :  { %634 = vmatpush3.bf16.msra.mxu0 %v633_v5  ;;  %v132_v13 = vld [vmem:[%s1037_s3 + $0x18] sm:$0xff]  ;;  %v657_v15 = vpack.c.bf16 %v130_v11, %v129_v10  ;;  %v39_v16 = vld [vmem:[%s1036_s1 + $0x30] sm:$0xff]  ;;  %v133_v19 = vld [vmem:[%s1037_s3 + $0x20] sm:$0xff] }
   0x5   :  { %635 = vmatprep.subr.bf16.mxu0 %v733_v0  ;;  %v40_v17 = vld [vmem:[%s1036_s1 + $0x38] sm:$0xff]  ;;  %v660_v18 = vpack.c.bf16 %v132_v13, %v131_v12  ;;  %v134_v20 = vld [vmem:[%s1037_s3 + $0x28] sm:$0xff]  ;;  %v41_v22 = vld [vmem:[%s1036_s1 + $0x40] sm:$0xff] }
   0x6   :  { %658 = vmatpush3.bf16.msra.mxu1 %v657_v15  ;;  %v642_v21 = vpack.c.bf16 %v40_v17, %v39_v16  ;;  %v42_v23 = vld [vmem:[%s1036_s1 + $0x48] sm:$0xff]  ;;  %v663_v24 = vpack.c.bf16 %v134_v20, %v133_v19  ;;  %v135_v25 = vld [vmem:[%s1037_s3 + $0x30] sm:$0xff]  ;;  %v136_v26 = vld [vmem:[%s1037_s3 + $0x38] sm:$0xff] }
   0x7   :  { %659 = vmatprep.subr.bf16.mxu1 %v733_v0  ;;  %v645_v27 = vpack.c.bf16 %v42_v23, %v41_v22  ;;  %v43_v28 = vld [vmem:[%s1036_s1 + $0x50] sm:$0xff]  ;;  %v44_v29 = vld [vmem:[%s1036_s1 + $0x58] sm:$0xff]  ;;  %v666_v30 = vpack.c.bf16 %v136_v26, %v135_v25  ;;  %v137_v31 = vld [vmem:[%s1037_s3 + $0x40] sm:$0xff] }
   0x8   :  { %637 = vmatpush3.bf16.msra.mxu0 %v636_v7  ;;  %v138_v32 = vld [vmem:[%s1037_s3 + $0x48] sm:$0xff]  ;;  %v648_v33 = vpack.c.bf16 %v44_v29, %v43_v28  ;;  %v45_v34 = vld [vmem:[%s1036_s1 + $0x60] sm:$0xff]  ;;  %v139_v37 = vld [vmem:[%s1037_s3 + $0x50] sm:$0xff] }
   0x9   :  { %638 = vmatprep.subr.bf16.mxu0 %v733_v0  ;;  %v46_v35 = vld [vmem:[%s1036_s1 + $0x68] sm:$0xff]  ;;  %v669_v36 = vpack.c.bf16 %v138_v32, %v137_v31  ;;  %v140_v38 = vld [vmem:[%s1037_s3 + $0x58] sm:$0xff]  ;;  %v47_v40 = vld [vmem:[%s1036_s1 + $0x70] sm:$0xff] }
   0xa   :  { %661 = vmatpush3.bf16.msra.mxu1 %v660_v18  ;;  %v651_v39 = vpack.c.bf16 %v46_v35, %v45_v34  ;;  %v48_v41 = vld [vmem:[%s1036_s1 + $0x78] sm:$0xff]  ;;  %v672_v42 = vpack.c.bf16 %v140_v38, %v139_v37  ;;  %v141_v43 = vld [vmem:[%s1037_s3 + $0x60] sm:$0xff]  ;;  %v142_v44 = vld [vmem:[%s1037_s3 + $0x68] sm:$0xff] }
   0xb   :  { %662 = vmatprep.subr.bf16.mxu1 %v733_v0  ;;  %v654_v45 = vpack.c.bf16 %v48_v41, %v47_v40  ;;  %v675_v46 = vpack.c.bf16 %v142_v44, %v141_v43  ;;  %v32_v47 = vld [vmem:[%s1038_s0] sm:$0xff]  ;;  %v143_v48 = vld [vmem:[%s1037_s3 + $0x70] sm:$0xff]  ;;  %v144_v49 = vld [vmem:[%s1037_s3 + $0x78] sm:$0xff] }
   0xc   :  { %640 = vmatpush3.bf16.msra.mxu0 %v639_v14  ;;  %v678_v50 = vpack.c.bf16 %v144_v49, %v143_v48  ;;  %v225_v51 = vld [vmem:[%s1039_s5] sm:$0xff]  ;;  %v226_v52 = vld [vmem:[%s1039_s5 + $0x8] sm:$0xff]  ;;  %v227_v53 = vld [vmem:[%s1039_s5 + $0x10] sm:$0xff] }
   0xd   :  { %641 = vmatprep.subr.bf16.mxu0 %v733_v0  ;;  %v681_v54 = vpack.c.bf16 %v226_v52, %v225_v51  ;;  %v228_v55 = vld [vmem:[%s1039_s5 + $0x18] sm:$0xff]  ;;  %v229_v57 = vld [vmem:[%s1039_s5 + $0x20] sm:$0xff]  ;;  %v230_v58 = vld [vmem:[%s1039_s5 + $0x28] sm:$0xff] }
   0xe   :  { %664 = vmatpush3.bf16.msra.mxu1 %v663_v24  ;;  %v684_v56 = vpack.c.bf16 %v228_v55, %v227_v53  ;;  %v687_v59 = vpack.c.bf16 %v230_v58, %v229_v57  ;;  %v231_v60 = vld [vmem:[%s1039_s5 + $0x30] sm:$0xff]  ;;  %v232_v61 = vld [vmem:[%s1039_s5 + $0x38] sm:$0xff]  ;;  %v233_v63 = vld [vmem:[%s1039_s5 + $0x40] sm:$0xff] }
   0xf   :  { %665 = vmatprep.subr.bf16.mxu1 %v733_v0  ;;  %v690_v62 = vpack.c.bf16 %v232_v61, %v231_v60  ;;  %v234_v1 = vld [vmem:[%s1039_s5 + $0x48] sm:$0xff]  ;;  %v235_v3 = vld [vmem:[%s1039_s5 + $0x50] sm:$0xff]  ;;  %v236_v5 = vld [vmem:[%s1039_s5 + $0x58] sm:$0xff] }
  0x10   :  { %643 = vmatpush3.bf16.msra.mxu0 %v642_v21  ;;  %v693_v2 = vpack.c.bf16 %v234_v1, %v233_v63  ;;  %v696_v6 = vpack.c.bf16 %v236_v5, %v235_v3  ;;  %v237_v7 = vld [vmem:[%s1039_s5 + $0x60] sm:$0xff]  ;;  %v238_v8 = vld [vmem:[%s1039_s5 + $0x68] sm:$0xff]  ;;  %v239_v16 = vld [vmem:[%s1039_s5 + $0x70] sm:$0xff] }
  0x11   :  { %644 = vmatprep.subr.bf16.mxu0 %v733_v0  ;;  %v699_v9 = vpack.c.bf16 %v238_v8, %v237_v7  ;;  %v420_v10 = vld [vmem:[%s1040_s2] ss:$0 sm:$0xff]  ;;  %v240_v17 = vld [vmem:[%s1039_s5 + $0x78] sm:$0xff]  ;;  %v322_v20 = vld [vmem:[%s1041_s7 + $0x8] sm:$0xff] }
  0x12   :  { %667 = vmatpush3.bf16.msra.mxu1 %v666_v30  ;;  %v702_v18 = vpack.c.bf16 %v240_v17, %v239_v16  ;;  %v321_v19 = vld [vmem:[%s1041_s7] sm:$0xff]  ;;  %v324_v22 = vld [vmem:[%s1041_s7 + $0x18] sm:$0xff]  ;;  %v326_v25 = vld [vmem:[%s1041_s7 + $0x28] sm:$0xff] }
  0x13   :  { %668 = vmatprep.subr.bf16.mxu1 %v733_v0  ;;  %v705_v21 = vpack.c.bf16 %v322_v20, %v321_v19  ;;  %v325_v24 = vld [vmem:[%s1041_s7 + $0x20] sm:$0xff]  ;;  %v328_v28 = vld [vmem:[%s1041_s7 + $0x38] sm:$0xff]  ;;  %v330_v31 = vld [vmem:[%s1041_s7 + $0x48] sm:$0xff] }
  0x14   :  { %646 = vmatpush3.bf16.msra.mxu0 %v645_v27  ;;  %v711_v26 = vpack.c.bf16 %v326_v25, %v325_v24  ;;  %v327_v27 = vld [vmem:[%s1041_s7 + $0x30] sm:$0xff]  ;;  %v329_v30 = vld [vmem:[%s1041_s7 + $0x40] sm:$0xff]  ;;  %v332_v34 = vld [vmem:[%s1041_s7 + $0x58] sm:$0xff] }
  0x15   :  { %647 = vmatprep.subr.bf16.mxu0 %v733_v0  ;;  %v714_v29 = vpack.c.bf16 %v328_v28, %v327_v27  ;;  %v717_v32 = vpack.c.bf16 %v330_v31, %v329_v30  ;;  %v334_v37 = vld [vmem:[%s1041_s7 + $0x68] sm:$0xff]  ;;  %v423_v53 = vld [vmem:[%s1044_s8] ss:$0 sm:$0xff] }
  0x16   :  { %670 = vmatpush3.bf16.msra.mxu1 %v669_v36  ;;  %v333_v36 = vld [vmem:[%s1041_s7 + $0x60] sm:$0xff] }
  0x17   :  { %671 = vmatprep.subr.bf16.mxu1 %v733_v0  ;;  %v723_v38 = vpack.c.bf16 %v334_v37, %v333_v36 }
  0x18   :  { %649 = vmatpush3.bf16.msra.mxu0 %v648_v33  ;;  %v331_v33 = vld [vmem:[%s1041_s7 + $0x50] sm:$0xff] }
  0x19   :  { %650 = vmatprep.subr.bf16.mxu0 %v733_v0  ;;  %v720_v35 = vpack.c.bf16 %v332_v34, %v331_v33 }
  0x1a   :  { %673 = vmatpush3.bf16.msra.mxu1 %v672_v42 }
  0x1b   :  { %674 = vmatprep.subr.bf16.mxu1 %v733_v0 }
  0x1c   :  { %652 = vmatpush3.bf16.msra.mxu0 %v651_v39  ;;  %v421_v39 = vld [vmem:[%s1042_s4] ss:$0 sm:$0xff] }
  0x1d   :  { %653 = vmatprep.subr.bf16.mxu0 %v733_v0 }
  0x1e   :  { %676 = vmatpush3.bf16.msra.mxu1 %v675_v46  ;;  %v336_v46 = vld [vmem:[%s1041_s7 + $0x78] sm:$0xff] }
  0x1f   :  { %677 = vmatprep.subr.bf16.mxu1 %v733_v0 }
  0x20   :  { %655 = vmatpush3.bf16.msra.mxu0 %v654_v45  ;;  %v335_v45 = vld [vmem:[%s1041_s7 + $0x70] sm:$0xff] }
  0x21   :  { %680 = vmatprep.subr.bf16.mxu0 %v733_v0 }
  0x22   :  { %679 = vmatpush3.bf16.msra.mxu1 %v678_v50 }
  0x23   :  { %525 = vmatmul.mubr.f32.vlgmr.msra.gmra.mrb[0].mxu0 %v32_v47  ;;  %704 = vmatprep.subr.bf16.mxu1 %v733_v0  ;;  %v422_v47 = vld [vmem:[%s1043_s6] ss:$0 sm:$0xff] }
  0x24   :  { %594 = vmatprep.mubr.msk.f32.mxu0 %vm734_vm0, %v735_v4  ;;  %682 = vmatpush3.bf16.msra.mxu0 %v681_v54 }
  0x25   :  { %683 = vmatprep.subr.bf16.mxu0 %v733_v0 }
  0x28   :  { %685 = vmatpush3.bf16.msra.mxu0 %v684_v56 }
  0x29   :  { %686 = vmatprep.subr.bf16.mxu0 %v733_v0 }
  0x2c   :  { %688 = vmatpush3.bf16.msra.mxu0 %v687_v59 }
  0x2d   :  { %689 = vmatprep.subr.bf16.mxu0 %v733_v0 }
  0x30   :  { %691 = vmatpush3.bf16.msra.mxu0 %v690_v62 }
  0x31   :  { %692 = vmatprep.subr.bf16.mxu0 %v733_v0 }
  0x34   :  { %694 = vmatpush3.bf16.msra.mxu0 %v693_v2 }
  0x35   :  { %695 = vmatprep.subr.bf16.mxu0 %v733_v0 }
  0x38   :  { %697 = vmatpush3.bf16.msra.mxu0 %v696_v6 }
  0x39   :  { %698 = vmatprep.subr.bf16.mxu0 %v733_v0 }
  0x3c   :  { %700 = vmatpush3.bf16.msra.mxu0 %v699_v9 }
  0x3d   :  { %701 = vmatprep.subr.bf16.mxu0 %v733_v0 }
  0x40   :  { %703 = vmatpush3.bf16.msra.mxu0 %v702_v18 }
  0xf6   :  { %v122_v11 = vpop.f32.mrb[0].mxu0 }
  0xf7   :  { %v123_v12 = vadd.f32 %v420_v10, %v122_v11  ;;  %v526_v13 = vpop.f32.mrb[1].mxu0 }
  0xf9   :  { %v127_v14 = vmul.f32 0.0001, %v123_v12  ;;  %vm126_vm1 = vcmp.gt.f32.partialorder %v123_v12, 0.0 }
  0xfb   :  { %v128_v15 = vsel %vm126_vm1, %v123_v12, %v127_v14 }
  0xfc   :  { %560 = vmatmul.mubr.f32.vlgmr.msra.gmra.mrb[0].mxu1 %v128_v15 }
  0xfd   :  { %629 = vmatprep.mubr.msk.f32.mxu1 %vm734_vm0, %v735_v4  ;;  %v323_v4 = vld [vmem:[%s1041_s7 + $0x10] sm:$0xff]  ;;  %706 = vmatpush3.bf16.msra.mxu1 %v705_v21 }
  0xfe   :  { %v708_v23 = vpack.c.bf16 %v324_v22, %v323_v4  ;;  %707 = vmatprep.subr.bf16.mxu1 %v733_v0 }
 0x101   :  { %709 = vmatpush3.bf16.msra.mxu1 %v708_v23 }
 0x102   :  { %710 = vmatprep.subr.bf16.mxu1 %v733_v0 }
 0x105   :  { %712 = vmatpush3.bf16.msra.mxu1 %v711_v26 }
 0x106   :  { %713 = vmatprep.subr.bf16.mxu1 %v733_v0 }
 0x109   :  { %715 = vmatpush3.bf16.msra.mxu1 %v714_v29 }
 0x10a   :  { %716 = vmatprep.subr.bf16.mxu1 %v733_v0 }
 0x10d   :  { %718 = vmatpush3.bf16.msra.mxu1 %v717_v32 }
 0x10e   :  { %719 = vmatprep.subr.bf16.mxu1 %v733_v0 }
 0x111   :  { %721 = vmatpush3.bf16.msra.mxu1 %v720_v35 }
 0x112   :  { %722 = vmatprep.subr.bf16.mxu1 %v733_v0 }
 0x115   :  { %724 = vmatpush3.bf16.msra.mxu1 %v723_v38 }
 0x116   :  { %725 = vmatprep.subr.bf16.mxu1 %v733_v0  ;;  %v726_v0 = vpack.c.bf16 %v336_v46, %v335_v45 }
 0x119   :  { %727 = vmatpush3.bf16.msra.mxu1 %v726_v0 }
 0x1cf   :  { %v218_v40 = vpop.f32.mrb[0].mxu1 }
 0x1d0   :  { %v219_v41 = vadd.f32 %v421_v39, %v218_v40  ;;  %v561_v42 = vpop.f32.mrb[1].mxu1 }
 0x1d2   :  { %vm222_vm2 = vcmp.gt.f32.partialorder %v219_v41, 0.0  ;;  %v223_v43 = vmul.f32 0.0001, %v219_v41 }
 0x1d4   :  { %v224_v44 = vsel %vm222_vm2, %v219_v41, %v223_v43 }
 0x1d5   :  { %595 = vmatmul.mubr.f32.vlgmr.msra.gmra.mrb[2].mxu0 %v224_v44 }
 0x2a8   :  { %v314_v48 = vpop.f32.mrb[2].mxu0 }
 0x2a9   :  { %v315_v49 = vadd.f32 %v422_v47, %v314_v48  ;;  %v596_v50 = vpop.f32.mrb[3].mxu0 }
 0x2ab   :  { %vm318_vm3 = vcmp.gt.f32.partialorder %v315_v49, 0.0  ;;  %v319_v51 = vmul.f32 0.0001, %v315_v49 }
 0x2ad   :  { %v320_v52 = vsel %vm318_vm3, %v315_v49, %v319_v51 }
 0x2ae   :  { %630 = vmatmul.mubr.f32.vlgmr.msra.gmra.mrb[2].mxu1 %v320_v52 }
 0x381   :  { %v410_v54 = vpop.f32.mrb[2].mxu1 }
 0x382   :  { %v411_v55 = vadd.f32 %v423_v53, %v410_v54  ;;  %v631_v56 = vpop.f32.mrb[3].mxu1 }
 0x384   :  { %731 = vtanh.f32 %v411_v55 }
 0x38e   :  { %v732_v57 = vpop.eup %731 }
 0x38f   :  { %415 = vst [vmem:[%s1045_s9] sm:$0xff] %v732_v57 }

</bundles_post_ra>
